<compile_context>
chip_gen: v6e
topology: v6e:2x2x1
jax: 0.10.0
libtpu: 0.0.40
codegen_flags: <defaults>
</compile_context>

<pallas_src>
import jax
import jax.numpy as jnp
from jax import lax
from jax.experimental import pallas as pl
from jax.experimental.pallas import tpu as pltpu


# ----------------------------------------------------------------------------
# 1. PositionAdjacency
# ----------------------------------------------------------------------------
def _position_adjacency_kernel(mean_ref, prec_ref, off_ref, out_ref):
    # mean_ref: SMEM f32[2]
    # prec_ref: SMEM f32[3]              packed symmetric precision [P00, P01, P11]
    # off_ref : VMEM f32[1, 2, TILE_H, W]
    # out_ref : VMEM f32[1, TILE_H, W]
    dx = off_ref[0, 0, :, :] - mean_ref[0]
    dy = off_ref[0, 1, :, :] - mean_ref[1]

    a = prec_ref[0]   # P[0,0]
    b = prec_ref[1]   # P[0,1] == P[1,0]
    c = prec_ref[2]   # P[1,1]

    # Quadratic form d^T P d per spatial position (kept on the VPU on purpose;
    # a 2x2 MXU formulation would only add layout shuffles).
    q = a * dx * dx + 2.0 * b * dx * dy + c * dy * dy
    k = jnp.exp(-q)

    # F.normalize(p=1, dim=-1): k > 0 so |k| == k.  Exact per-row reciprocal
    # (keeps the 1e-5 tolerance on this path) followed by a multiply.
    denom = jnp.maximum(jnp.sum(k, axis=-1, keepdims=True), 1e-12)
    out_ref[0, :, :] = k * pl.reciprocal(denom, approx=False)


def _build_packed_prec(log_chol):
    # chol = [[exp(l0), 0], [l1, exp(l2)]];  prec = chol @ chol.T
    l0, l1, l2 = log_chol[0], log_chol[1], log_chol[2]
    chol = jnp.array([[jnp.exp(l0), 0.0], [l1, jnp.exp(l2)]], dtype=jnp.float32)
    prec = chol @ chol.T
    return jnp.stack([prec[0, 0], prec[0, 1], prec[1, 1]]).astype(jnp.float32)


def _pick_tile_h(H, W):
    """Largest multiple-of-8 divisor of H whose single-tile footprint stays
    under ~2 MiB.  With double-buffering this is ~4-5 MiB -- safely inside even
    v5e's 16 MiB default scoped-VMEM limit, and ~1-2 MiB elementwise tiles are
    already near the HBM roofline."""
    budget_bytes = 2 * 1024 * 1024             # per single tile (x2 buffers)
    bytes_per_row = (2 + 1) * W * 4            # 2 offset rows + 1 output row, f32
    max_rows = max(8, budget_bytes // max(bytes_per_row, 1))
    if H <= max_rows:
        return H                               # whole H fits in one block
    for cand in (1024, 512, 256, 128, 64, 32, 16, 8):
        if cand <= max_rows and H % cand == 0:
            return cand
    # TODO(synk): H with no multiple-of-8 divisor under the budget falls back
    # to the full-H block; prefer a padded/masked tail tile for such shapes.
    return H


def position_adjacency(offsets, mean, log_chol):
    """offsets: f32[B, 2, H, W] (NCHW). Returns L1-row-normalized f32[B, H, W]."""
    B, C, H, W = offsets.shape
    assert C == 2
    prec_packed = _build_packed_prec(log_chol)
    tile_h = _pick_tile_h(H, W)

    return pl.pallas_call(
        _position_adjacency_kernel,
        out_shape=jax.ShapeDtypeStruct((B, H, W), jnp.float32),
        grid=(B, H // tile_h),
        in_specs=[
            pl.BlockSpec(memory_space=pltpu.MemorySpace.SMEM),        # mean (2,)
            pl.BlockSpec(memory_space=pltpu.MemorySpace.SMEM),        # prec (3,)
            pl.BlockSpec((1, 2, tile_h, W), lambda b, h: (b, 0, h, 0)),
        ],
        out_specs=pl.BlockSpec((1, tile_h, W), lambda b, h: (b, h, 0)),
        compiler_params=pltpu.CompilerParams(
            dimension_semantics=("parallel", "parallel")),
    )(mean, prec_packed, offsets)


# ----------------------------------------------------------------------------
# Row-tile picker shared by kernels 2 and 3
# ----------------------------------------------------------------------------
def _pick_tile_q(N):
    """Row tile for the N axis: caps the (TQ, N) logits / adjacency row block
    at ~2 MiB per buffer and keeps TQ a multiple of 16 (bf16 sublane packing)
    that divides N."""
    budget_bytes = 2 * 1024 * 1024
    max_rows = max(16, budget_bytes // max(4 * N, 1))
    if N <= max_rows:
        return N
    for cand in (512, 256, 128, 64, 32, 16):
        if cand <= max_rows and N % cand == 0:
            return cand
    # TODO(synk): ragged N with no suitable divisor falls back to the full
    # block; prefer a padded/masked tail tile for such shapes.
    return N


# ----------------------------------------------------------------------------
# 2. Attention MLP + reassociated GCN operands (row-wise, so fully tileable)
# ----------------------------------------------------------------------------
def _attn_precompute_kernel(f_ref, w1_ref, b1_ref, w2_ref, b2_ref,
                            wa_ref, wr_ref,
                            fattn_ref, xwa_ref, xwr_ref):
    # f_ref: f32[1, TQ, C_in]; weights bf16; biases f32; outputs bf16.
    x_bf = f_ref[0].astype(jnp.bfloat16)
    h = jnp.maximum(
        jnp.dot(x_bf, w1_ref[...], preferred_element_type=jnp.float32)
        + b1_ref[...], 0.0)
    # TODO(synk): Dropout(p=0.5) between the conv layers is identity (eval mode).
    fattn = (jnp.dot(h.astype(jnp.bfloat16), w2_ref[...],
                     preferred_element_type=jnp.float32) + b2_ref[...])
    fattn_ref[0] = fattn.astype(jnp.bfloat16)
    # Reassociated GCN operands: (adj @ x) @ W == adj @ (x @ W).
    xwa_ref[0] = jnp.dot(x_bf, wa_ref[...],
                         preferred_element_type=jnp.float32).astype(jnp.bfloat16)
    xwr_ref[0] = jnp.dot(x_bf, wr_ref[...],
                         preferred_element_type=jnp.float32).astype(jnp.bfloat16)


def attention_precompute(features, w1t, b1, w2t, b2, wat, wrt, tq=None):
    B, N, C_in = features.shape
    H2 = w1t.shape[1]
    C_out = wat.shape[1]
    tq = tq or _pick_tile_q(N)
    assert N % tq == 0
    bf = jnp.bfloat16

    return pl.pallas_call(
        _attn_precompute_kernel,
        out_shape=(jax.ShapeDtypeStruct((B, N, C_in), bf),
                   jax.ShapeDtypeStruct((B, N, C_out), bf),
                   jax.ShapeDtypeStruct((B, N, C_out), bf)),
        grid=(B, N // tq),
        in_specs=[
            pl.BlockSpec((1, tq, C_in), lambda b, q: (b, q, 0)),
            pl.BlockSpec((C_in, H2), lambda b, q: (0, 0)),
            pl.BlockSpec((1, H2), lambda b, q: (0, 0)),
            pl.BlockSpec((H2, C_in), lambda b, q: (0, 0)),
            pl.BlockSpec((1, C_in), lambda b, q: (0, 0)),
            pl.BlockSpec((C_in, C_out), lambda b, q: (0, 0)),
            pl.BlockSpec((C_in, C_out), lambda b, q: (0, 0)),
        ],
        out_specs=[
            pl.BlockSpec((1, tq, C_in), lambda b, q: (b, q, 0)),
            pl.BlockSpec((1, tq, C_out), lambda b, q: (b, q, 0)),
            pl.BlockSpec((1, tq, C_out), lambda b, q: (b, q, 0)),
        ],
        compiler_params=pltpu.CompilerParams(
            dimension_semantics=("parallel", "parallel")),
    )(features, w1t.astype(bf), b1, w2t.astype(bf), b2,
      wat.astype(bf), wrt.astype(bf))


# ----------------------------------------------------------------------------
# 3. Fused Gram + softmax + dual GCNUpdate + concat-Linear (adj_a stays in VMEM)
# ----------------------------------------------------------------------------
def _fused_attn_gcn_kernel(fattn_all_ref, fattn_row_ref, xwa_ref, xwr_ref,
                           adj_r_ref, ba_ref, br_ref,
                           wla_ref, wlr_ref, bl_ref, out_ref):
    # fattn_all_ref : bf16[1, N, C]      resident per batch
    # fattn_row_ref : bf16[1, TQ, C]     row block
    # xwa/xwr_ref   : bf16[1, N, C_out]  resident per batch (x @ Wa, x @ Wr)
    # adj_r_ref     : f32 [1, TQ, N]     row block of the position adjacency
    # out_ref       : f32 [1, TQ, C_out]
    fattn_rows = fattn_row_ref[0]                        # (TQ, C) bf16
    fattn_all = fattn_all_ref[0]                         # (N, C)  bf16

    # Gram row block: contract the last dim of both operands directly so no
    # XLU transpose of fattn is needed before the MXU push.
    logits = lax.dot_general(
        fattn_rows, fattn_all,
        dimension_numbers=(((1,), (1,)), ((), ())),
        preferred_element_type=jnp.float32)              # (TQ, N) f32

    # Row softmax -- adj_a never leaves VMEM.  Approx reciprocal goes to the
    # EUP slot (essentially free); the matmul path tolerance covers it.
    m = jnp.max(logits, axis=-1, keepdims=True)
    e = jnp.exp(logits - m)
    adj_a = e * pl.reciprocal(jnp.sum(e, axis=-1, keepdims=True), approx=True)

    # GCN updates, reassociated: relu(adj @ (x @ W) + b).
    fa = jnp.maximum(
        jnp.dot(adj_a.astype(jnp.bfloat16), xwa_ref[0],
                preferred_element_type=jnp.float32) + ba_ref[...], 0.0)
    fr = jnp.maximum(
        jnp.dot(adj_r_ref[0].astype(jnp.bfloat16), xwr_ref[0],
                preferred_element_type=jnp.float32) + br_ref[...], 0.0)

    # Final Linear on the concat: cat(fa, fr) @ WL^T == fa @ WLa^T + fr @ WLr^T.
    out_ref[0] = (jnp.dot(fa.astype(jnp.bfloat16), wla_ref[...],
                          preferred_element_type=jnp.float32)
                  + jnp.dot(fr.astype(jnp.bfloat16), wlr_ref[...],
                            preferred_element_type=jnp.float32)
                  + bl_ref[...])


def fused_attention_gcn(fattn, xwa, xwr, adj_r, ba, br, wlat, wlrt, bl, tq=None):
    B, N, C = fattn.shape
    C_out = xwa.shape[2]
    tq = tq or _pick_tile_q(N)
    assert N % tq == 0
    bf = jnp.bfloat16

    return pl.pallas_call(
        _fused_attn_gcn_kernel,
        out_shape=jax.ShapeDtypeStruct((B, N, C_out), jnp.float32),
        grid=(B, N // tq),
        in_specs=[
            pl.BlockSpec((1, N, C), lambda b, q: (b, 0, 0)),       # fattn (all rows)
            pl.BlockSpec((1, tq, C), lambda b, q: (b, q, 0)),      # fattn (row block)
            pl.BlockSpec((1, N, C_out), lambda b, q: (b, 0, 0)),   # x @ Wa
            pl.BlockSpec((1, N, C_out), lambda b, q: (b, 0, 0)),   # x @ Wr
            pl.BlockSpec((1, tq, N), lambda b, q: (b, q, 0)),      # adj_r rows
            pl.BlockSpec((1, C_out), lambda b, q: (0, 0)),         # ba
            pl.BlockSpec((1, C_out), lambda b, q: (0, 0)),         # br
            pl.BlockSpec((C_out, C_out), lambda b, q: (0, 0)),     # WLa^T
            pl.BlockSpec((C_out, C_out), lambda b, q: (0, 0)),     # WLr^T
            pl.BlockSpec((1, C_out), lambda b, q: (0, 0)),         # bl
        ],
        out_specs=pl.BlockSpec((1, tq, C_out), lambda b, q: (b, q, 0)),
        compiler_params=pltpu.CompilerParams(
            dimension_semantics=("parallel", "parallel")),
    )(fattn, fattn, xwa, xwr, adj_r, ba, br,
      wlat.astype(bf), wlrt.astype(bf), bl)


# ----------------------------------------------------------------------------
# Full GCNLayer forward
# ----------------------------------------------------------------------------
def gcn_layer(features, offsets, p, tq=None):
    adj_r = position_adjacency(offsets, p["mean"], p["log_chol"])
    fattn, xwa, xwr = attention_precompute(
        features, p["w1t"], p["b1"], p["w2t"], p["b2"], p["wat"], p["wrt"], tq=tq)
    out = fused_attention_gcn(fattn, xwa, xwr, adj_r,
                              p["ba"], p["br"], p["wlat"], p["wlrt"], p["bl"],
                              tq=tq)
    return out, adj_r


# ----------------------------------------------------------------------------
# Pure-JAX reference (mirrors the PyTorch forward, dropout = identity)
# ----------------------------------------------------------------------------
def _reference_gcn_layer(features, offsets, p):
    hp = jax.lax.Precision.HIGHEST
    lc = p["log_chol"]
    chol = jnp.array([[jnp.exp(lc[0]), 0.0], [lc[1], jnp.exp(lc[2])]], jnp.float32)
    prec = chol @ chol.T
    diff = offsets - p["mean"].reshape(1, 2, 1, 1)
    q = jnp.einsum("bihw,ij,bjhw->bhw", diff, prec, diff, precision=hp)
    k = jnp.exp(-q)
    adj_r = k / jnp.maximum(jnp.sum(jnp.abs(k), axis=-1, keepdims=True), 1e-12)

    h = jax.nn.relu(jnp.einsum("bnc,ch->bnh", features, p["w1t"], precision=hp) + p["b1"])
    fattn = jnp.einsum("bnh,hc->bnc", h, p["w2t"], precision=hp) + p["b2"]
    logits = jnp.einsum("bnc,bmc->bnm", fattn, fattn, precision=hp)
    adj_a = jax.nn.softmax(logits, axis=-1)

    agg_a = jnp.einsum("bnm,bmc->bnc", adj_a, features, precision=hp)
    fa = jax.nn.relu(jnp.einsum("bnc,co->bno", agg_a, p["wat"], precision=hp) + p["ba"])
    agg_r = jnp.einsum("bnm,bmc->bnc", adj_r, features, precision=hp)
    fr = jax.nn.relu(jnp.einsum("bnc,co->bno", agg_r, p["wrt"], precision=hp) + p["br"])
    out = (jnp.einsum("bno,op->bnp", fa, p["wlat"], precision=hp)
           + jnp.einsum("bno,op->bnp", fr, p["wlrt"], precision=hp)
           + p["bl"])
    return out, adj_r


if __name__ == "__main__":
    B, N, C_in, C_out = 2, 128, 32, 32
    key = jax.random.PRNGKey(0)
    ks = jax.random.split(key, 13)
    s = 0.1

    features = jax.random.normal(ks[0], (B, N, C_in), dtype=jnp.float32)
    offsets = jax.random.normal(ks[1], (B, 2, N, N), dtype=jnp.float32)

    params = dict(
        # PositionAdjacency params exactly as in __init__:
        mean=jnp.zeros((2,), jnp.float32),
        log_chol=jnp.full((3,), -2.3, jnp.float32),
        # Attention MLP (weights stored pre-transposed: y = x @ W^T + b):
        w1t=s * jax.random.normal(ks[2], (C_in, 2 * C_in), jnp.float32),
        b1=s * jax.random.normal(ks[3], (1, 2 * C_in), jnp.float32),
        w2t=s * jax.random.normal(ks[4], (2 * C_in, C_in), jnp.float32),
        b2=s * jax.random.normal(ks[5], (1, C_in), jnp.float32),
        # GC_a / GC_r linear layers:
        wat=s * jax.random.normal(ks[6], (C_in, C_out), jnp.float32),
        ba=s * jax.random.normal(ks[7], (1, C_out), jnp.float32),
        wrt=s * jax.random.normal(ks[8], (C_in, C_out), jnp.float32),
        br=s * jax.random.normal(ks[9], (1, C_out), jnp.float32),
        # Final Linear(2*C_out -> C_out), split into features_a / features_r halves:
        wlat=s * jax.random.normal(ks[10], (C_out, C_out), jnp.float32),
        wlrt=s * jax.random.normal(ks[11], (C_out, C_out), jnp.float32),
        bl=s * jax.random.normal(ks[12], (1, C_out), jnp.float32),
    )

    # tq=64 forces a (B, 2)-step grid so the row-tiled path is exercised.
    out, adj_r = gcn_layer(features, offsets, params, tq=64)
    out = jax.block_until_ready(out)
    adj_r = jax.block_until_ready(adj_r)

    ref_out, ref_adj_r = _reference_gcn_layer(features, offsets, params)
    assert out.shape == (B, N, C_out)
    assert adj_r.shape == (B, N, N)
    # PositionAdjacency path is f32 elementwise-only -> tight tolerance.
    assert jnp.allclose(adj_r, ref_adj_r, atol=1e-5, rtol=1e-5)
    # Matmul path runs bf16 on the MXU with f32 accumulation -> looser tolerance.
    assert jnp.allclose(out, ref_out, atol=2e-2, rtol=2e-2)

    print("KERNEL_OK")
</pallas_src>

<mosaic_0001>
module attributes {stable_mosaic.version = 11 : i64} {
  func.func @_position_adjacency_kernel(%arg0: i32, %arg1: i32, %arg2: memref<2xf32, #tpu.memory_space<smem>>, %arg3: memref<3xf32, #tpu.memory_space<smem>>, %arg4: memref<1x2x128x128xf32, #tpu.memory_space<vmem>>, %arg5: memref<1x128x128xf32, #tpu.memory_space<vmem>>) attributes {dimension_semantics = [#tpu.dimension_semantics<parallel>, #tpu.dimension_semantics<parallel>], iteration_bounds = array<i64: 2, 1>, scalar_prefetch = 0 : i64, scratch_operands = 0 : i64, tpu.core_type = #tpu.core_type<tc>, window_params = [{transform_indices = @transform_0, window_bounds = array<i64: 2>}, {transform_indices = @transform_1, window_bounds = array<i64: 3>}, {transform_indices = @transform_2, window_bounds = array<i64: 1, 2, 128, 128>}, {transform_indices = @transform_3, window_bounds = array<i64: 1, 128, 128>}]} {
    %c0 = arith.constant 0 : index
    %c0_0 = arith.constant 0 : index
    %c0_1 = arith.constant 0 : index
    %c0_2 = arith.constant 0 : index
    %0 = vector.load %arg4[%c0, %c0_0, %c0_1, %c0_2] : memref<1x2x128x128xf32, #tpu.memory_space<vmem>>, vector<1x1x128x128xf32>
    %1 = vector.shape_cast %0 : vector<1x1x128x128xf32> to vector<128x128xf32>
    %c0_3 = arith.constant 0 : index
    %2 = memref.load %arg2[%c0_3] : memref<2xf32, #tpu.memory_space<smem>>
    %3 = vector.broadcast %2 : f32 to vector<128x128xf32>
    %4 = arith.subf %1, %3 : vector<128x128xf32>
    %c0_4 = arith.constant 0 : index
    %c1 = arith.constant 1 : index
    %c0_5 = arith.constant 0 : index
    %c0_6 = arith.constant 0 : index
    %5 = vector.load %arg4[%c0_4, %c1, %c0_5, %c0_6] : memref<1x2x128x128xf32, #tpu.memory_space<vmem>>, vector<1x1x128x128xf32>
    %6 = vector.shape_cast %5 : vector<1x1x128x128xf32> to vector<128x128xf32>
    %c1_7 = arith.constant 1 : index
    %7 = memref.load %arg2[%c1_7] : memref<2xf32, #tpu.memory_space<smem>>
    %8 = vector.broadcast %7 : f32 to vector<128x128xf32>
    %9 = arith.subf %6, %8 : vector<128x128xf32>
    %c0_8 = arith.constant 0 : index
    %10 = memref.load %arg3[%c0_8] : memref<3xf32, #tpu.memory_space<smem>>
    %c1_9 = arith.constant 1 : index
    %11 = memref.load %arg3[%c1_9] : memref<3xf32, #tpu.memory_space<smem>>
    %c2 = arith.constant 2 : index
    %12 = memref.load %arg3[%c2] : memref<3xf32, #tpu.memory_space<smem>>
    %13 = vector.broadcast %10 : f32 to vector<128x128xf32>
    %14 = arith.mulf %13, %4 : vector<128x128xf32>
    %15 = arith.mulf %14, %4 : vector<128x128xf32>
    %cst = arith.constant 2.000000e+00 : f32
    %16 = arith.mulf %cst, %11 : f32
    %17 = vector.broadcast %16 : f32 to vector<128x128xf32>
    %18 = arith.mulf %17, %4 : vector<128x128xf32>
    %19 = arith.mulf %18, %9 : vector<128x128xf32>
    %20 = arith.addf %15, %19 : vector<128x128xf32>
    %21 = vector.broadcast %12 : f32 to vector<128x128xf32>
    %22 = arith.mulf %21, %9 : vector<128x128xf32>
    %23 = arith.mulf %22, %9 : vector<128x128xf32>
    %24 = arith.addf %20, %23 : vector<128x128xf32>
    %cst_10 = arith.constant 0.000000e+00 : f32
    %25 = vector.broadcast %cst_10 : f32 to vector<128x128xf32>
    %26 = arith.subf %25, %24 : vector<128x128xf32>
    %27 = math.exp %26 : vector<128x128xf32>
    %cst_11 = arith.constant dense<0.000000e+00> : vector<128xf32>
    %28 = vector.multi_reduction <add>, %27, %cst_11 [1] : vector<128x128xf32> to vector<128xf32>
    %29 = vector.shape_cast %28 : vector<128xf32> to vector<128x1xf32>
    %cst_12 = arith.constant 9.99999996E-13 : f32
    %30 = vector.broadcast %cst_12 : f32 to vector<128x1xf32>
    %31 = arith.maximumf %29, %30 : vector<128x1xf32>
    %32 = tpu.reciprocal %31 : vector<128x1xf32> -> vector<128x1xf32>
    %33 = vector.broadcast %32 : vector<128x1xf32> to vector<128x128xf32>
    %34 = arith.mulf %27, %33 : vector<128x128xf32>
    %c0_13 = arith.constant 0 : index
    %c0_14 = arith.constant 0 : index
    %c0_15 = arith.constant 0 : index
    %35 = vector.load %arg5[%c0_13, %c0_14, %c0_15] : memref<1x128x128xf32, #tpu.memory_space<vmem>>, vector<1x128x128xf32>
    %36 = vector.shape_cast %35 : vector<1x128x128xf32> to vector<128x128xf32>
    %37 = vector.shape_cast %34 : vector<128x128xf32> to vector<1x128x128xf32>
    tpu.vector_store %arg5[%c0_13, %c0_14, %c0_15], %37 {strides = array<i32>} : memref<1x128x128xf32, #tpu.memory_space<vmem>>, vector<1x128x128xf32>,
    return
  }
  func.func @transform_0(%arg0: i32, %arg1: i32) -> i32 {
    %c0_i32 = arith.constant 0 : i32
    %c0_i32_0 = arith.constant 0 : i32
    return %c0_i32 : i32
  }
  func.func @transform_1(%arg0: i32, %arg1: i32) -> i32 {
    %c0_i32 = arith.constant 0 : i32
    %c0_i32_0 = arith.constant 0 : i32
    return %c0_i32 : i32
  }
  func.func @transform_2(%arg0: i32, %arg1: i32) -> (i32, i32, i32, i32) {
    %c0_i32 = arith.constant 0 : i32
    %c0_i32_0 = arith.constant 0 : i32
    %c0_i32_1 = arith.constant 0 : i32
    return %arg0, %c0_i32, %arg1, %c0_i32_0 : i32, i32, i32, i32
  }
  func.func @transform_3(%arg0: i32, %arg1: i32) -> (i32, i32, i32) {
    %c0_i32 = arith.constant 0 : i32
    %c0_i32_0 = arith.constant 0 : i32
    return %arg0, %arg1, %c0_i32 : i32, i32, i32
  }
}

</mosaic_0001>

<bundles_post_ra>
// kernel: tpu_custom_call.1
= control target key start
LH: loop header
LB: loop body
LE: loop exit
PB: predicated region body
PF: predicated region fallthrough
CT: control target
= control target key end

     0   :  { %s1463_s0 = inlined_call_operand.hbm [shape: f32[2], index: 0, kind: input, shape index: {}]   ;;  %s1464_s1 = inlined_call_operand.vmem [shape: f32[3], index: 1, kind: input, shape index: {}]   ;;  %s1465_s2 = inlined_call_operand.hbm [shape: f32[2,2,128,128], index: 2, kind: input, shape index: {}]   ;;  %s1466_s3 = inlined_call_operand.hbm [shape: f32[2,128,128], index: 3, kind: output, shape index: {}]  }
   0x1   :  { %1468 = sst [smem:[#allocation14_spill]] %s1463_s0 }
   0x2   :  { %8 = vsyncpa [#allocation5], 0 }
   0x3   :  { %9 = vsyncpa [#allocation6], 0 }
   0x4   :  { %10 = vsyncpa [#allocation3], 0 }
   0x5   :  { %12 = vsyncpa [#allocation3 + $0x1], 0 }
   0x6   :  { %13 = vsyncpa [#allocation4], 0 }
   0x7   :  { %15 = vsyncpa [#allocation4 + $0x1], 0  ;;  %s1072_s12 = smov 0   ;;  %s1074_s13 = smov 0  }
   0x8   :  { %s1076_s14 = smov 0   ;;  %s1078_s15 = smov 0  }
   0x9   :  { %s1080_s16 = smov 0   ;;  %s1082_s17 = smov 0  }
   0xa LB: > { %s709_s18 = sadd.s32 4294967295, %s1042_s17   ;;  %s710_s19 = sadd.s32 4294967294, %s1042_s17   ;;  %s1042_s17 = sphi %s1082_s17, %s21_s17   ;;  %s1038_s16 = sphi %s1080_s16, %s1484_s16   ;;  %s1034_s15 = sphi %s1078_s15, %s1483_s15   ;;  %s1030_s14 = sphi %s1076_s14, %s1482_s14   ;;  %s1026_s13 = sphi %s1074_s13, %s1481_s13   ;;  %s1022_s12 = sphi %s1072_s12, %s1480_s12  }
   0xb   : > { %s84_s20 = sadd.s32 1, %s1030_s14  ;;  %p91_p0 = scmp.ne.s32.totalorder %s1030_s14, %s1026_s13 }
   0xc   : > { %p92_p1 = scmp.eq.s32.totalorder %s1042_s17, 0  ;;  %p97_p2 = scmp.ne.s32.totalorder %s1026_s13, %s1022_s12 }
   0xd   : > { %p1110_p3 = scmp.eq.s32.totalorder %s709_s18, 0  ;;  %p123_p4 = scmp.eq.s32.totalorder %s709_s18, 1 }
   0xe   : > { %p93_p5 = por %p92_p1, %p91_p0  ;;  %p129_p6 = scmp.eq.s32.totalorder %s710_s19, 1 }
   0xf   : > { %p1116_p7 = por %p1110_p3, %p97_p2  ;;  %p1120_p8 = por %p123_p4, %p91_p0 }
  0x10   : > { %p1124_p9 = por %p129_p6, %p97_p2  ;;  %p711_p10 = scmp.ge.s32.totalorder %s1042_s17, 1 }
  0x11   : > { %s1471_s23 = scalar_select %p1120_p8, 1, 0 }
  0x12   : > { %s1472_s24 = scalar_select %p1124_p9, 1, 0 }
  0x13   : > { %p136_p11 = scmp.lt.s32.totalorder %s1042_s17, 3  ;;  %p778_p1 = scmp.lt.s32.totalorder %s1042_s17, 2 }
  0x14   : > { %s158_s28 = sshll.u32 %s1464_s1, 4  ;;  %s169_s4 = sand.u32 1, %s1030_s14   ;;  %s159_s28 = int_to_ptr.vmem [resolvable:$true] %s158_s28 }
  0x15   : > { %p1131_p13 = pnand %p711_p10, %p136_p11  ;;  %p1141_p4 = pnand %p778_p1, %p93_p5 }
  0x16   : > { %s33_s5 = sadd.s32 1, %s1038_s16  ;;  %s1044_s6 = smov [#allocation2]  }
  0x17   : > { %p761_p0 = pneg %p1131_p13  ;;  %s1476_s0 = sld [smem:[#allocation14_spill]] }
  0x18   : > { %s911_s9 = scalar_lea.vmem %s159_s28, 16  ;;  %p919_p1 = scmp.lt.s32.totalorder %s159_s28, %s159_s28 }
  0x19   : > { %p1147_p2 = pnand %p761_p0, %p1110_p3  ;;  %p912_p5 = scmp.ne.s32.totalorder %s159_s28, %s911_s9 }
  0x1a   : > { %p920_p0 = scmp.lt.s32.totalorder %s911_s9, %s911_s9 }
  0x1b   : > { %p913_p6 = pneg %p1147_p2 }
  0x1c   : > { %p921_p12 = por %p920_p0, %p919_p1 }
  0x1d   : > { %764 = dma.hbm_to_smem (!%p1147_p2), %s1476_s0, 16, %s1044_s6, [#allocation5]  }
  0x1e   : > { %p914_p10 = pnand %p913_p6, %p912_p5 }
  0x20   : > { %p915_p11 = pneg %p914_p10 }
  0x22   : > { %p922_p9 = pnand %p921_p12, %p915_p11 }
  0x24   : > { %925 = shalt.err (!%p922_p9)
}
  0x25   : > { %s1045_s10 = smov [#allocation7]   ;;  %p35_p8 = scmp.ge.s32.totalorder %s33_s5, 2 }
  0x26   : > { %767 = dma.vmem_to_smem (!%p1147_p2), %s159_s28, 16, %s1045_s10, [#allocation6]  }
  0x27   : > { %s715_s11 = sshll.u32 %s169_s4, 8  ;;  %s747_s18 = sshll.u32 %s1038_s16, 12 }
  0x28   : > { %s1486_s5 = smov (%p35_p8, %s33_s5), 0  ;;  %s181_s27 = scalar_lea.hbm %s1465_s2, %s747_s18 }
  0x29   : > { %s79_s6 = ssub.s32 %s1038_s16, %s1486_s5  ;;  %s173_s7 = scalar_lea.vmem [#allocation8], %s715_s11 }
  0x2a   : > { %s182_s8 = sshll.u32 %s173_s7, 4  ;;  %p82_p9 = scmp.eq.s32.totalorder %s79_s6, 0  ;;  %s183_s8 = int_to_ptr.vmem [resolvable:$true] %s182_s8 }
  0x2b   : > { %s170_s9 = scalar_lea.sflag [#allocation3], %s169_s4  ;;  %p928_p12 = pneg %p1141_p4 }
  0x2c   : > { %s1173_s30 = scalar_select %p82_p9, %s1030_s14, %s84_s20  }
  0x2d   : > { %s939_s28 = scalar_lea.vmem %s183_s8, 4096  ;;  %s1046_s10 = smov [#allocation8]  }
  0x2e   : > { %p940_p2 = scmp.ne.s32.totalorder %s183_s8, %s939_s28  ;;  %s944_s0 = sshll.u32 %s1046_s10, 4  ;;  %s945_s0 = int_to_ptr.vmem [resolvable:$false] %s944_s0 }
  0x2f   : > { %s946_s19 = scalar_lea.vmem %s945_s0, 8192  ;;  %p947_p6 = scmp.lt.s32.totalorder %s183_s8, %s945_s0 }
  0x30   : > { %p942_p8 = pnand %p940_p2, %p928_p12  ;;  %p948_p10 = scmp.lt.s32.totalorder %s946_s19, %s939_s28 }
  0x32   : > { %p943_p5 = pneg %p942_p8  ;;  %p949_p11 = por %p948_p10, %p947_p6 }
  0x34   : > { %p950_p1 = pnand %p949_p11, %p943_p5 }
  0x36   : > { %953 = shalt.err (!%p950_p1)
}
  0x37   : > { %s1047_s11 = smov 128   ;;  %s1048_s20 = smov 8  }
  0x38   : > { %771 = dma.hbm_to_vmem [thread:$0]  (!%p1141_p4), %s181_s27, 4096, %s183_s8, %s170_s9, %s1047_s11, %s1047_s11, %s1048_s20  }
  0x39   : > { %194 = sbr.rel (%p1131_p13) target bundleno = 322 (0x142), region = 32 }
  0x3e   : > { %1005 = dma.done.wait (%p1110_p3), [#allocation5], 16  }
  0x3f   : > { %1007 = vsyncadd (%p1110_p3), [#allocation5], 4294967280 }
  0x40   : > { %1009 = dma.done.wait (%p1110_p3), [#allocation6], 16  }
  0x41   : > { %1011 = vsyncadd (%p1110_p3), [#allocation6], 4294967280  ;;  %s1190_s0 = sand.u32 1, %s1026_s13  }
  0x42   : > { %s721_s25 = sshll.u32 %s1190_s0, 8  ;;  %s205_s29 = scalar_lea.sflag [#allocation3], %s1190_s0 }
  0x43   : > { %s1194_s4 = scalar_lea.vmem [#allocation8], %s721_s25 }
  0x44   : > { %1013 = dma.done.wait (%p1116_p7), %s205_s29, 4096  }
  0x45   : > { %1015 = vsyncadd (%p1116_p7), %s205_s29, 4294963200 }
  0x46   : > { %213 = sfence }
  0x47   : > { %s250_s18 = sld [smem:[#allocation2]]  ;;  %v236_v0 = vld [vmem:[%s1194_s4 + $0x10] sm:$0xff]  ;;  %v234_v1 = vld [vmem:[%s1194_s4] sm:$0xff]  ;;  %v237_v2 = vld [vmem:[%s1194_s4 + $0x18] sm:$0xff]  ;;  %s722_s7 = sshll.u32 %s1190_s0, 7 }
  0x48   : > { %s739_s21 = sld [smem:[#allocation2 + $0x1]]  ;;  %v725_v3 = vld [vmem:[%s1194_s4 + $0x90] sm:$0xff]  ;;  %v723_v4 = vld [vmem:[%s1194_s4 + $0x80] sm:$0xff]  ;;  %v726_v5 = vld [vmem:[%s1194_s4 + $0x98] sm:$0xff]  ;;  %s1376_s8 = scalar_lea.vmem [#allocation9], %s722_s7 }
  0x49   : > { %s303_s26 = sld [smem:[#allocation7]]  ;;  %v235_v7 = vld [vmem:[%s1194_s4 + $0x8] sm:$0xff]  ;;  %v238_v51 = vld [vmem:[%s1194_s4 + $0x20] sm:$0xff]  ;;  %s748_s9 = sshll.u32 %s1034_s15, 11 }
  0x4a   : > { %s1200_s27 = sld [smem:[#allocation7 + $0x1]]  ;;  %v724_v12 = vld [vmem:[%s1194_s4 + $0x88] sm:$0xff]  ;;  %v727_v56 = vld [vmem:[%s1194_s4 + $0xa0] sm:$0xff]  ;;  %s598_s28 = sshll.u32 %s1376_s8, 4  ;;  %s1413_s28 = int_to_ptr.vmem [resolvable:$true] %s598_s28 }
  0x4b   : > { %s741_s6 = sld [smem:[#allocation7 + $0x2]]  ;;  %v239_v13 = vld [vmem:[%s1194_s4 + $0x28] sm:$0xff]  ;;  %s1411_s11 = scalar_lea.hbm %s1466_s3, %s748_s9 }
  0x4c   : > { %v728_v14 = vld [vmem:[%s1194_s4 + $0xa8] sm:$0xff]  ;;  %s583_s20 = scalar_lea.sflag [#allocation4], %s1190_s0  ;;  %s954_s25 = scalar_lea.vmem %s1413_s28, 2048 }
  0x4d   : > { %v1208_v6 = vstv %s250_s18  ;;  %p955_p3 = scmp.ne.s32.totalorder %s1413_s28, %s954_s25  ;;  %p1477_p7 = scmp.ne.s32.totalorder %s1471_s23, 0 }
  0x4e   : > { %v254_v8 = vsub.f32 %v236_v0, %v1208_v6  ;;  %v1212_v9 = vstv %s739_s21  ;;  %v252_v10 = vsub.f32 %v234_v1, %v1208_v6  ;;  %v255_v11 = vsub.f32 %v237_v2, %v1208_v6  ;;  %s1049_s15 = smov [#allocation9]  }
  0x4f   : > { %v289_v15 = vsub.f32 %v725_v3, %v1212_v9  ;;  %v1220_v16 = vstv %s303_s26  ;;  %v287_v17 = vsub.f32 %v723_v4, %v1212_v9  ;;  %v290_v18 = vsub.f32 %v726_v5, %v1212_v9  ;;  %p956_p13 = pnand %p955_p3, %p1477_p7  ;;  %s958_s29 = sshll.u32 %s1049_s15, 4  ;;  %s959_s29 = int_to_ptr.vmem [resolvable:$false] %s958_s29 }
  0x50   : > { %v309_v19 = vmul.f32 %v1220_v16, %v254_v8  ;;  %s339_s22 = smul.f32 2.0, %s1200_s27  ;;  %v307_v20 = vmul.f32 %v1220_v16, %v252_v10  ;;  %v310_v21 = vmul.f32 %v1220_v16, %v255_v11  ;;  %v253_v22 = vsub.f32 %v235_v7, %v1208_v6  ;;  %p961_p0 = scmp.lt.s32.totalorder %s1413_s28, %s959_s29 }
  0x51   : > { %v1229_v23 = vstv %s741_s6  ;;  %v288_v24 = vsub.f32 %v724_v12, %v1212_v9  ;;  %v257_v25 = vsub.f32 %v239_v13, %v1208_v6  ;;  %v292_v26 = vsub.f32 %v728_v14, %v1212_v9  ;;  %p957_p4 = pneg %p956_p13 }
  0x52   : > { %v325_v27 = vmul.f32 %v309_v19, %v254_v8  ;;  %v1234_v28 = vstv %s339_s22  ;;  %v392_v29 = vmul.f32 %v1229_v23, %v289_v15  ;;  %v323_v30 = vmul.f32 %v307_v20, %v252_v10 }
  0x53   : > { %v343_v31 = vmul.f32 %v1234_v28, %v254_v8  ;;  %v341_v32 = vmul.f32 %v1234_v28, %v252_v10  ;;  %v390_v33 = vmul.f32 %v1229_v23, %v287_v17  ;;  %v326_v34 = vmul.f32 %v310_v21, %v255_v11 }
  0x54   : > { %v408_v35 = vmul.f32 %v392_v29, %v289_v15  ;;  %v344_v36 = vmul.f32 %v1234_v28, %v255_v11  ;;  %v393_v37 = vmul.f32 %v1229_v23, %v290_v18  ;;  %v308_v38 = vmul.f32 %v1220_v16, %v253_v22  ;;  %v241_v11 = vld [vmem:[%s1194_s4 + $0x38] sm:$0xff] }
  0x55   : > { %v359_v39 = vmul.f32 %v343_v31, %v289_v15  ;;  %v357_v40 = vmul.f32 %v341_v32, %v287_v17  ;;  %v406_v41 = vmul.f32 %v390_v33, %v287_v17  ;;  %v342_v42 = vmul.f32 %v1234_v28, %v253_v22  ;;  %v730_v17 = vld [vmem:[%s1194_s4 + $0xb8] sm:$0xff]  ;;  %v729_v31 = vld [vmem:[%s1194_s4 + $0xb0] sm:$0xff] }
  0x56   : > { %v360_v43 = vmul.f32 %v344_v36, %v290_v18  ;;  %v409_v44 = vmul.f32 %v393_v37, %v290_v18  ;;  %v324_v45 = vmul.f32 %v308_v38, %v253_v22  ;;  %v391_v46 = vmul.f32 %v1229_v23, %v288_v24  ;;  %v240_v22 = vld [vmem:[%s1194_s4 + $0x30] sm:$0xff]  ;;  %v243_v38 = vld [vmem:[%s1194_s4 + $0x48] sm:$0xff] }
  0x57   : > { %v375_v47 = vadd.f32 %v359_v39, %v325_v27  ;;  %v373_v48 = vadd.f32 %v357_v40, %v323_v30  ;;  %v358_v49 = vmul.f32 %v342_v42, %v288_v24  ;;  %v312_v50 = vmul.f32 %v1220_v16, %v257_v25 }
  0x58   : > { %v376_v52 = vadd.f32 %v360_v43, %v326_v34  ;;  %v407_v53 = vmul.f32 %v391_v46, %v288_v24  ;;  %v346_v54 = vmul.f32 %v1234_v28, %v257_v25  ;;  %v395_v55 = vmul.f32 %v1229_v23, %v292_v26  ;;  %v732_v43 = vld [vmem:[%s1194_s4 + $0xc8] sm:$0xff] }
  0x59   : > { %v424_v57 = vadd.f32 %v408_v35, %v375_v47  ;;  %v422_v58 = vadd.f32 %v406_v41, %v373_v48  ;;  %v374_v59 = vadd.f32 %v358_v49, %v324_v45  ;;  %v328_v60 = vmul.f32 %v312_v50, %v257_v25 }
  0x5a   : > { %v425_v61 = vadd.f32 %v409_v44, %v376_v52  ;;  %v362_v62 = vmul.f32 %v346_v54, %v292_v26  ;;  %v411_v63 = vmul.f32 %v395_v55, %v292_v26  ;;  %v256_v0 = vsub.f32 %v238_v51, %v1208_v6  ;;  %v242_v44 = vld [vmem:[%s1194_s4 + $0x40] sm:$0xff] }
  0x5b   : > { %v440_v1 = vsub.f32 0.0, %v424_v57  ;;  %v438_v2 = vsub.f32 0.0, %v422_v58  ;;  %v423_v3 = vadd.f32 %v407_v53, %v374_v59  ;;  %v291_v4 = vsub.f32 %v727_v56, %v1212_v9  ;;  %v731_v52 = vld [vmem:[%s1194_s4 + $0xc0] sm:$0xff] }
  0x5c   : > { %v441_v5 = vsub.f32 0.0, %v425_v61  ;;  %v378_v7 = vadd.f32 %v362_v62, %v328_v60  ;;  %v311_v8 = vmul.f32 %v1220_v16, %v256_v0  ;;  %v345_v10 = vmul.f32 %v1234_v28, %v256_v0 }
  0x5d   : > { %v458_v12 = vmul.f32 1.442695, %v440_v1  ;;  %v454_v13 = vmul.f32 1.442695, %v438_v2  ;;  %v439_v14 = vsub.f32 0.0, %v423_v3  ;;  %v394_v15 = vmul.f32 %v1229_v23, %v291_v4 }
  0x5e   : > { %v460_v18 = vmul.f32 1.442695, %v441_v5  ;;  %v427_v19 = vadd.f32 %v411_v63, %v378_v7  ;;  %v327_v20 = vmul.f32 %v311_v8, %v256_v0  ;;  %v361_v21 = vmul.f32 %v345_v10, %v291_v4  ;;  %v245_v0 = vld [vmem:[%s1194_s4 + $0x58] sm:$0xff] }
  0x5f   : > { %836 = vpow2.f32 %v458_v12  ;;  %v456_v24 = vmul.f32 1.442695, %v439_v14  ;;  %v410_v25 = vmul.f32 %v394_v15, %v291_v4  ;;  %v259_v26 = vsub.f32 %v241_v11, %v1208_v6  ;;  %v734_v5 = vld [vmem:[%s1194_s4 + $0xd8] sm:$0xff] }
  0x60   : > { %838 = vpow2.f32 %v454_v13  ;;  %v443_v27 = vsub.f32 0.0, %v427_v19  ;;  %v377_v29 = vadd.f32 %v361_v21, %v327_v20  ;;  %v294_v30 = vsub.f32 %v730_v17, %v1212_v9  ;;  %v244_v17 = vld [vmem:[%s1194_s4 + $0x50] sm:$0xff] }
  0x61   : > { %840 = vpow2.f32 %v460_v18  ;;  %v314_v32 = vmul.f32 %v1220_v16, %v259_v26  ;;  %v348_v33 = vmul.f32 %v1234_v28, %v259_v26  ;;  %v258_v34 = vsub.f32 %v240_v22, %v1208_v6 }
  0x62   : > { %842 = vpow2.f32 %v456_v24  ;;  %v464_v35 = vmul.f32 1.442695, %v443_v27  ;;  %v426_v36 = vadd.f32 %v410_v25, %v377_v29  ;;  %v397_v37 = vmul.f32 %v1229_v23, %v294_v30  ;;  %v733_v24 = vld [vmem:[%s1194_s4 + $0xd0] sm:$0xff] }
  0x63   : > { %v330_v39 = vmul.f32 %v314_v32, %v259_v26  ;;  %v364_v40 = vmul.f32 %v348_v33, %v294_v30  ;;  %v293_v41 = vsub.f32 %v729_v31, %v1212_v9  ;;  %v313_v42 = vmul.f32 %v1220_v16, %v258_v34 }
  0x64   : > { %844 = vpow2.f32 %v464_v35  ;;  %v442_v45 = vsub.f32 0.0, %v426_v36  ;;  %v413_v46 = vmul.f32 %v397_v37, %v294_v30  ;;  %v347_v47 = vmul.f32 %v1234_v28, %v258_v34 }
  0x65   : > { %v380_v48 = vadd.f32 %v364_v40, %v330_v39  ;;  %v329_v49 = vmul.f32 %v313_v42, %v258_v34  ;;  %v396_v50 = vmul.f32 %v1229_v23, %v293_v41  ;;  %v261_v51 = vsub.f32 %v243_v38, %v1208_v6  ;;  %v247_v40 = vld [vmem:[%s1194_s4 + $0x68] sm:$0xff] }
  0x66   : > { %v462_v53 = vmul.f32 1.442695, %v442_v45  ;;  %v363_v54 = vmul.f32 %v347_v47, %v293_v41  ;;  %v296_v55 = vsub.f32 %v732_v43, %v1212_v9  ;;  %v260_v56 = vsub.f32 %v242_v44, %v1208_v6 }
  0x67   : > { %v429_v57 = vadd.f32 %v413_v46, %v380_v48  ;;  %v412_v58 = vmul.f32 %v396_v50, %v293_v41  ;;  %v316_v59 = vmul.f32 %v1220_v16, %v261_v51  ;;  %v350_v60 = vmul.f32 %v1234_v28, %v261_v51  ;;  %v736_v41 = vld [vmem:[%s1194_s4 + $0xe8] sm:$0xff] }
  0x68   : > { %846 = vpow2.f32 %v462_v53  ;;  %v379_v61 = vadd.f32 %v363_v54, %v329_v49  ;;  %v399_v62 = vmul.f32 %v1229_v23, %v296_v55  ;;  %v295_v63 = vsub.f32 %v731_v52, %v1212_v9  ;;  %v246_v54 = vld [vmem:[%s1194_s4 + $0x60] sm:$0xff] }
  0x69   : > { %v445_v1 = vsub.f32 0.0, %v429_v57  ;;  %v332_v2 = vmul.f32 %v316_v59, %v261_v51  ;;  %v366_v3 = vmul.f32 %v350_v60, %v296_v55  ;;  %v315_v4 = vmul.f32 %v1220_v16, %v260_v56 }
  0x6a   : > { %v428_v7 = vadd.f32 %v412_v58, %v379_v61  ;;  %v415_v8 = vmul.f32 %v399_v62, %v296_v55  ;;  %v349_v10 = vmul.f32 %v1234_v28, %v260_v56  ;;  %v398_v11 = vmul.f32 %v1229_v23, %v295_v63  ;;  %v735_v55 = vld [vmem:[%s1194_s4 + $0xe0] sm:$0xff] }
  0x6b   : > { %v468_v12 = vmul.f32 1.442695, %v445_v1  ;;  %v382_v13 = vadd.f32 %v366_v3, %v332_v2  ;;  %v331_v14 = vmul.f32 %v315_v4, %v260_v56  ;;  %v263_v15 = vsub.f32 %v245_v0, %v1208_v6  ;;  %v249_v4 = vld [vmem:[%s1194_s4 + $0x78] sm:$0xff] }
  0x6c   : > { %v1287_v18 = vpop.eup %836  ;;  %v444_v19 = vsub.f32 0.0, %v428_v7  ;;  %v365_v20 = vmul.f32 %v349_v10, %v295_v63  ;;  %v414_v21 = vmul.f32 %v398_v11, %v295_v63  ;;  %v298_v22 = vsub.f32 %v734_v5, %v1212_v9  ;;  %v738_v5 = vld [vmem:[%s1194_s4 + $0xf8] sm:$0xff] }
  0x6d   : > { %v1291_v25 = vpop.eup %838  ;;  %490 = vadd.xlane.f32.xlu1 %v1287_v18  ;;  %848 = vpow2.f32 %v468_v12  ;;  %v431_v26 = vadd.f32 %v415_v8, %v382_v13  ;;  %v318_v27 = vmul.f32 %v1220_v16, %v263_v15  ;;  %v352_v29 = vmul.f32 %v1234_v28, %v263_v15 }
  0x6e   : > { %v1296_v30 = vpop.eup %840  ;;  %486 = vadd.xlane.f32.xlu0 %v1291_v25  ;;  %v466_v31 = vmul.f32 1.442695, %v444_v19  ;;  %v381_v32 = vadd.f32 %v365_v20, %v331_v14  ;;  %v401_v33 = vmul.f32 %v1229_v23, %v298_v22  ;;  %v262_v34 = vsub.f32 %v244_v17, %v1208_v6 }
  0x6f   : > { %v1301_v35 = vpop.eup %842  ;;  %v447_v36 = vsub.f32 0.0, %v431_v26  ;;  %v334_v37 = vmul.f32 %v318_v27, %v263_v15  ;;  %v368_v38 = vmul.f32 %v352_v29, %v298_v22  ;;  %v297_v39 = vsub.f32 %v733_v24, %v1212_v9  ;;  %v737_v27 = vld [vmem:[%s1194_s4 + $0xf0] sm:$0xff] }
  0x70   : > { %850 = vpow2.f32 %v466_v31  ;;  %v430_v42 = vadd.f32 %v414_v21, %v381_v32  ;;  %v417_v43 = vmul.f32 %v401_v33, %v298_v22  ;;  %v317_v44 = vmul.f32 %v1220_v16, %v262_v34  ;;  %v248_v21 = vld [vmem:[%s1194_s4 + $0x70] sm:$0xff]  ;;  %s960_s4 = scalar_lea.vmem %s959_s29, 4096 }
  0x71   : > { %v1307_v45 = vpop.eup %844  ;;  %492 = vadd.xlane.f32.xlu1 %v1296_v30  ;;  %v472_v46 = vmul.f32 1.442695, %v447_v36  ;;  %v384_v47 = vadd.f32 %v368_v38, %v334_v37  ;;  %v351_v48 = vmul.f32 %v1234_v28, %v262_v34  ;;  %v400_v49 = vmul.f32 %v1229_v23, %v297_v39  ;;  %p962_p9 = scmp.lt.s32.totalorder %s960_s4, %s954_s25 }
  0x72   : > { %488 = vadd.xlane.f32.xlu0 %v1301_v35  ;;  %v446_v50 = vsub.f32 0.0, %v430_v42  ;;  %v333_v51 = vmul.f32 %v317_v44, %v262_v34  ;;  %v265_v52 = vsub.f32 %v247_v40, %v1208_v6  ;;  %v300_v53 = vsub.f32 %v736_v41, %v1212_v9 }
  0x73   : > { %852 = vpow2.f32 %v472_v46  ;;  %v433_v56 = vadd.f32 %v417_v43, %v384_v47  ;;  %v367_v57 = vmul.f32 %v351_v48, %v297_v39  ;;  %v416_v58 = vmul.f32 %v400_v49, %v297_v39  ;;  %p963_p12 = por %p962_p9, %p961_p0 }
  0x74   : > { %v470_v59 = vmul.f32 1.442695, %v446_v50  ;;  %v320_v60 = vmul.f32 %v1220_v16, %v265_v52  ;;  %v354_v61 = vmul.f32 %v1234_v28, %v265_v52  ;;  %v403_v62 = vmul.f32 %v1229_v23, %v300_v53 }
  0x75   : > { %v1320_v63 = vpop.eup %846  ;;  %496 = vadd.xlane.f32.xlu1 %v1307_v45  ;;  %v449_v0 = vsub.f32 0.0, %v433_v56  ;;  %v383_v1 = vadd.f32 %v367_v57, %v333_v51  ;;  %v264_v2 = vsub.f32 %v246_v54, %v1208_v6  ;;  %v299_v3 = vsub.f32 %v735_v55, %v1212_v9  ;;  %p964_p2 = pnand %p963_p12, %p957_p4 }
  0x76   : > { %494 = vadd.xlane.f32.xlu0 %v1320_v63  ;;  %854 = vpow2.f32 %v470_v59  ;;  %v336_v7 = vmul.f32 %v320_v60, %v265_v52  ;;  %v370_v8 = vmul.f32 %v354_v61, %v300_v53  ;;  %v419_v10 = vmul.f32 %v403_v62, %v300_v53 }
  0x77   : > { %v476_v11 = vmul.f32 1.442695, %v449_v0  ;;  %v432_v12 = vadd.f32 %v416_v58, %v383_v1  ;;  %v319_v13 = vmul.f32 %v1220_v16, %v264_v2  ;;  %v353_v14 = vmul.f32 %v1234_v28, %v264_v2 }
  0x78   : > { %v386_v15 = vadd.f32 %v370_v8, %v336_v7  ;;  %v402_v17 = vmul.f32 %v1229_v23, %v299_v3  ;;  %v267_v19 = vsub.f32 %v249_v4, %v1208_v6  ;;  %v302_v20 = vsub.f32 %v738_v5, %v1212_v9 }
  0x79   : > { %856 = vpow2.f32 %v476_v11  ;;  %v448_v22 = vsub.f32 0.0, %v432_v12  ;;  %v335_v24 = vmul.f32 %v319_v13, %v264_v2  ;;  %v369_v26 = vmul.f32 %v353_v14, %v299_v3 }
  0x7a   : > { %v1335_v29 = vpop.eup %848  ;;  %v435_v31 = vadd.f32 %v419_v10, %v386_v15  ;;  %v418_v32 = vmul.f32 %v402_v17, %v299_v3  ;;  %v322_v33 = vmul.f32 %v1220_v16, %v267_v19  ;;  %v356_v34 = vmul.f32 %v1234_v28, %v267_v19 }
  0x7b   : > { %500 = vadd.xlane.f32.xlu1 %v1335_v29  ;;  %v474_v36 = vmul.f32 1.442695, %v448_v22  ;;  %v385_v37 = vadd.f32 %v369_v26, %v335_v24  ;;  %v405_v38 = vmul.f32 %v1229_v23, %v302_v20  ;;  %v266_v39 = vsub.f32 %v248_v21, %v1208_v6 }
  0x7c   : > { %v451_v40 = vsub.f32 0.0, %v435_v31  ;;  %v338_v41 = vmul.f32 %v322_v33, %v267_v19  ;;  %v372_v42 = vmul.f32 %v356_v34, %v302_v20  ;;  %v301_v43 = vsub.f32 %v737_v27, %v1212_v9 }
  0x7d   : > { %v1343_v44 = vpop.eup %850  ;;  %858 = vpow2.f32 %v474_v36  ;;  %v434_v46 = vadd.f32 %v418_v32, %v385_v37  ;;  %v421_v47 = vmul.f32 %v405_v38, %v302_v20  ;;  %v321_v48 = vmul.f32 %v1220_v16, %v266_v39 }
  0x7e   : > { %498 = vadd.xlane.f32.xlu0 %v1343_v44  ;;  %v480_v49 = vmul.f32 1.442695, %v451_v40  ;;  %v388_v50 = vadd.f32 %v372_v42, %v338_v41  ;;  %v355_v51 = vmul.f32 %v1234_v28, %v266_v39  ;;  %v404_v6 = vmul.f32 %v1229_v23, %v301_v43 }
  0x7f   : > { %v450_v52 = vsub.f32 0.0, %v434_v46  ;;  %v337_v53 = vmul.f32 %v321_v48, %v266_v39 }
  0x80   : > { %v1349_v54 = vpop.eup %852  ;;  %860 = vpow2.f32 %v480_v49  ;;  %v437_v9 = vadd.f32 %v421_v47, %v388_v50  ;;  %v371_v55 = vmul.f32 %v355_v51, %v301_v43  ;;  %v420_v56 = vmul.f32 %v404_v6, %v301_v43 }
  0x81   : > { %504 = vadd.xlane.f32.xlu1 %v1349_v54  ;;  %v478_v57 = vmul.f32 1.442695, %v450_v52 }
  0x82   : > { %v453_v16 = vsub.f32 0.0, %v437_v9  ;;  %v387_v58 = vadd.f32 %v371_v55, %v337_v53 }
  0x83   : > { %v1352_v59 = vpop.eup %854  ;;  %862 = vpow2.f32 %v478_v57 }
  0x84   : > { %502 = vadd.xlane.f32.xlu0 %v1352_v59  ;;  %v484_v28 = vmul.f32 1.442695, %v453_v16  ;;  %v436_v23 = vadd.f32 %v420_v56, %v387_v58 }
  0x86   : > { %v1355_v60 = vpop.eup %856  ;;  %864 = vpow2.f32 %v484_v28  ;;  %v452_v61 = vsub.f32 0.0, %v436_v23 }
  0x87   : > { %508 = vadd.xlane.f32.xlu1 %v1355_v60 }
  0x88   : > { %v482_v62 = vmul.f32 1.442695, %v452_v61 }
  0x8a   : > { %v1358_v0 = vpop.eup %858  ;;  %866 = vpow2.f32 %v482_v62 }
  0x8b   : > { %506 = vadd.xlane.f32.xlu0 %v1358_v0 }
  0x8d   : > { %v1361_v1 = vpop.eup %860 }
  0x8e   : > { %512 = vadd.xlane.f32.xlu1 %v1361_v1 }
  0x90   : > { %v1364_v2 = vpop.eup %862 }
  0x91   : > { %510 = vadd.xlane.f32.xlu0 %v1364_v2 }
  0x93   : > { %v1367_v3 = vpop.eup %864 }
  0x94   : > { %516 = vadd.xlane.f32.xlu1 %v1367_v3 }
  0x97   : > { %v1370_v4 = vpop.eup %866 }
  0x98   : > { %514 = vadd.xlane.f32.xlu0 %v1370_v4 }
  0xf6   : > { %v491_v5 = vpop.xlane.xlu1 %490 }
  0xf7   : > { %v520_v7 = vmax.f32 %v491_v5, 1e-12  ;;  %v487_v8 = vpop.xlane.xlu0 %486 }
  0xf8   : > { %v518_v10 = vmax.f32 %v487_v8, 1e-12 }
  0xf9   : > { %868 = vrcp.f32 %v520_v7 }
  0xfa   : > { %870 = vrcp.f32 %v518_v10  ;;  %v493_v11 = vpop.xlane.xlu1 %492 }
  0xfb   : > { %v521_v12 = vmax.f32 %v493_v11, 1e-12  ;;  %v489_v13 = vpop.xlane.xlu0 %488 }
  0xfc   : > { %v519_v14 = vmax.f32 %v489_v13, 1e-12 }
  0xfd   : > { %872 = vrcp.f32 %v521_v12 }
  0xfe   : > { %874 = vrcp.f32 %v519_v14  ;;  %v497_v15 = vpop.xlane.xlu1 %496 }
  0xff   : > { %v523_v17 = vmax.f32 %v497_v15, 1e-12  ;;  %v495_v19 = vpop.xlane.xlu0 %494 }
 0x100   : > { %v522_v20 = vmax.f32 %v495_v19, 1e-12 }
 0x101   : > { %876 = vrcp.f32 %v523_v17 }
 0x102   : > { %878 = vrcp.f32 %v522_v20 }
 0x104   : > { %v501_v21 = vpop.xlane.xlu1 %500 }
 0x105   : > { %v525_v22 = vmax.f32 %v501_v21, 1e-12 }
 0x106   : > { %v869_v24 = vpop.eup %868 }
 0x107   : > { %v871_v26 = vpop.eup %870  ;;  %v552_v27 = vmul.f32 %v869_v24, %v1287_v18  ;;  %880 = vrcp.f32 %v525_v22  ;;  %v499_v31 = vpop.xlane.xlu0 %498 }
 0x108   : > { %v550_v32 = vmul.f32 %v871_v26, %v1291_v25  ;;  %v524_v33 = vmax.f32 %v499_v31, 1e-12 }
 0x109   : > { %568 = vst [vmem:[%s1376_s8 + $0x10] sm:$0xff] %v552_v27 }
 0x10a   : > { %v873_v34 = vpop.eup %872  ;;  %566 = vst [vmem:[%s1376_s8] sm:$0xff] %v550_v32  ;;  %882 = vrcp.f32 %v524_v33  ;;  %v505_v36 = vpop.xlane.xlu1 %504 }
 0x10b   : > { %v875_v37 = vpop.eup %874  ;;  %v553_v18 = vmul.f32 %v873_v34, %v1296_v30  ;;  %v527_v38 = vmax.f32 %v505_v36, 1e-12 }
 0x10c   : > { %v551_v25 = vmul.f32 %v875_v37, %v1301_v35 }
 0x10d   : > { %569 = vst [vmem:[%s1376_s8 + $0x18] sm:$0xff] %v553_v18  ;;  %884 = vrcp.f32 %v527_v38  ;;  %v503_v39 = vpop.xlane.xlu0 %502 }
 0x10e   : > { %v877_v40 = vpop.eup %876  ;;  %567 = vst [vmem:[%s1376_s8 + $0x8] sm:$0xff] %v551_v25  ;;  %v526_v41 = vmax.f32 %v503_v39, 1e-12 }
 0x10f   : > { %v879_v42 = vpop.eup %878  ;;  %v555_v43 = vmul.f32 %v877_v40, %v1307_v45 }
 0x110   : > { %v554_v46 = vmul.f32 %v879_v42, %v1320_v63  ;;  %886 = vrcp.f32 %v526_v41  ;;  %v509_v47 = vpop.xlane.xlu1 %508 }
 0x111   : > { %571 = vst [vmem:[%s1376_s8 + $0x28] sm:$0xff] %v555_v43  ;;  %v529_v30 = vmax.f32 %v509_v47, 1e-12 }
 0x112   : > { %570 = vst [vmem:[%s1376_s8 + $0x20] sm:$0xff] %v554_v46 }
 0x113   : > { %888 = vrcp.f32 %v529_v30 }
 0x114   : > { %v881_v35 = vpop.eup %880  ;;  %v507_v48 = vpop.xlane.xlu0 %506 }
 0x115   : > { %v557_v49 = vmul.f32 %v881_v35, %v1335_v29  ;;  %v528_v50 = vmax.f32 %v507_v48, 1e-12 }
 0x117   : > { %v883_v51 = vpop.eup %882  ;;  %573 = vst [vmem:[%s1376_s8 + $0x38] sm:$0xff] %v557_v49  ;;  %890 = vrcp.f32 %v528_v50  ;;  %v513_v6 = vpop.xlane.xlu1 %512 }
 0x118   : > { %v556_v45 = vmul.f32 %v883_v51, %v1343_v44  ;;  %v531_v63 = vmax.f32 %v513_v6, 1e-12 }
 0x11a   : > { %v885_v52 = vpop.eup %884  ;;  %572 = vst [vmem:[%s1376_s8 + $0x30] sm:$0xff] %v556_v45  ;;  %892 = vrcp.f32 %v531_v63  ;;  %v511_v53 = vpop.xlane.xlu0 %510 }
 0x11b   : > { %v559_v9 = vmul.f32 %v885_v52, %v1349_v54  ;;  %v530_v55 = vmax.f32 %v511_v53, 1e-12 }
 0x11d   : > { %v887_v56 = vpop.eup %886  ;;  %575 = vst [vmem:[%s1376_s8 + $0x48] sm:$0xff] %v559_v9  ;;  %894 = vrcp.f32 %v530_v55  ;;  %v517_v29 = vpop.xlane.xlu1 %516 }
 0x11e   : > { %v558_v57 = vmul.f32 %v887_v56, %v1352_v59  ;;  %v533_v16 = vmax.f32 %v517_v29, 1e-12 }
 0x120   : > { %v889_v58 = vpop.eup %888  ;;  %574 = vst [vmem:[%s1376_s8 + $0x40] sm:$0xff] %v558_v57  ;;  %896 = vrcp.f32 %v533_v16 }
 0x121   : > { %v561_v44 = vmul.f32 %v889_v58, %v1355_v60  ;;  %v515_v28 = vpop.xlane.xlu0 %514 }
 0x122   : > { %v532_v54 = vmax.f32 %v515_v28, 1e-12 }
 0x123   : > { %577 = vst [vmem:[%s1376_s8 + $0x58] sm:$0xff] %v561_v44 }
 0x124   : > { %v891_v23 = vpop.eup %890  ;;  %898 = vrcp.f32 %v532_v54 }
 0x125   : > { %v560_v61 = vmul.f32 %v891_v23, %v1358_v0 }
 0x127   : > { %v893_v62 = vpop.eup %892  ;;  %576 = vst [vmem:[%s1376_s8 + $0x50] sm:$0xff] %v560_v61 }
 0x128   : > { %v563_v59 = vmul.f32 %v893_v62, %v1361_v1 }
 0x12a   : > { %v895_v5 = vpop.eup %894  ;;  %579 = vst [vmem:[%s1376_s8 + $0x68] sm:$0xff] %v563_v59 }
 0x12b   : > { %v562_v60 = vmul.f32 %v895_v5, %v1364_v2 }
 0x12d   : > { %v897_v7 = vpop.eup %896  ;;  %578 = vst [vmem:[%s1376_s8 + $0x60] sm:$0xff] %v562_v60 }
 0x12e   : > { %v565_v8 = vmul.f32 %v897_v7, %v1367_v3 }
 0x130   : > { %581 = vst [vmem:[%s1376_s8 + $0x78] sm:$0xff] %v565_v8 }
 0x131   : > { %v899_v10 = vpop.eup %898 }
 0x132   : > { %v564_v0 = vmul.f32 %v899_v10, %v1370_v4 }
 0x134   : > { %580 = vst [vmem:[%s1376_s8 + $0x70] sm:$0xff] %v564_v0 }
 0x135   : > { %967 = shalt.err (!%p964_p2)
}
 0x136   : > { %s968_s18 = scalar_lea.hbm %s1411_s11, 2048  ;;  %s972_s27 = scalar_lea.hbm %s1466_s3, 4096 }
 0x137   : > { %p969_p8 = scmp.ne.s32.totalorder %s1411_s11, %s968_s18  ;;  %p973_p10 = scmp.lt.s32.totalorder %s1411_s11, %s1466_s3 }
 0x138   : > { %p974_p11 = scmp.lt.s32.totalorder %s972_s27, %s968_s18 }
 0x139   : > { %p970_p5 = pnand %p969_p8, %p1477_p7 }
 0x13a   : > { %p975_p1 = por %p974_p11, %p973_p10 }
 0x13b   : > { %p971_p6 = pneg %p970_p5 }
 0x13d   : > { %p976_p3 = pnand %p975_p1, %p971_p6 }
 0x13f   : > { %979 = shalt.err (!%p976_p3)
}
 0x140   : > { %s1050_s7 = smov 128   ;;  %s1051_s8 = smov 8  }
 0x141   : > { %759 = dma.vmem_to_hbm [thread:$0]  (%p1477_p7), %s1413_s28, 2048, %s1411_s11, %s583_s20, %s1050_s7, %s1050_s7, %s1051_s8  }
 0x142 PF: > { %s613_s9 = sand.u32 1, %s1022_s12   ;;  %p1478_p13 = scmp.ne.s32.totalorder %s1472_s24, 0 }
 0x143   : > { %p1479_p4 = scmp.ge.s32.totalorder %s1042_s17, 2  ;;  %s614_s10 = scalar_lea.sflag [#allocation4], %s613_s9 }
 0x145   : > { %p773_p0 = pnand %p1479_p4, %p1478_p13 }
 0x147   : > { %p774_p9 = pneg %p773_p0 }
 0x149   : > { %1017 = dma.done.wait (%p774_p9), %s614_s10, 2048  }
 0x14a   : > { %1019 = vsyncadd (%p774_p9), %s614_s10, 4294965248  ;;  %s21_s17 = sadd.s32 1, %s1042_s17   ;;  %s1480_s12 = smov %s1026_s13 }
 0x14b   : > { %p18_p12 = scmp.ge.s32.totalorder %s21_s17, 4   ;;  %s1481_s13 = smov %s1030_s14 }
 0x14c   : > { %s1482_s14 = smov %s1173_s30  ;;  %s1483_s15 = smov %s1038_s16 }
 0x14d   : > { %s1484_s16 = smov %s1486_s5  ;;  %20 = sbr.rel (!%p18_p12) target bundleno = 10 (0xa), region = 88 }
 0x152   :  { %619 = vsyncpa [#allocation3], 1 }
 0x153   :  { %621 = vsyncpa [#allocation3 + $0x1], 1 }
 0x154   :  { %622 = vsyncpa [#allocation4], 1 }
 0x155   :  { %624 = vsyncpa [#allocation4 + $0x1], 1 }
 0x156   :  { %625 = vsyncpa [#allocation5], 1 }
 0x157   :  { %627 = vsyncpa [#allocation5 + $0x1], 1 }
 0x158   :  { %628 = vsyncpa [#allocation6], 1 }
 0x159   :  { %630 = vsyncpa [#allocation6 + $0x1], 1 }

</bundles_post_ra>
